<compile_context>
chip_gen: v5e
topology: v5e:2x2
jax: 0.10.0
libtpu: 0.0.40
codegen_flags: <defaults>
</compile_context>

<pallas_src>
import math

import jax
import jax.numpy as jnp
from jax.experimental import pallas as pl
from jax.experimental.pallas import tpu as pltpu

_LANE = 128       # vreg lane width
_SUBLANE = 8      # 32-bit sublane count
# Per-block byte budget.  in + out, double-buffered => ~4x this resident in
# VMEM, far below v7x's 32 MiB default scoped VMEM limit.
_MAX_BLOCK_BYTES = 4 * 1024 * 1024


def _identity_kernel(x_ref, o_ref):
    o_ref[...] = x_ref[...]


def _row_tile(rows: int, row_bytes: int) -> int:
    """Largest multiple of _SUBLANE that divides `rows` and fits the budget."""
    cap = max(_SUBLANE, _MAX_BLOCK_BYTES // max(row_bytes, 1))
    cap = min(rows, (cap // _SUBLANE) * _SUBLANE)
    tb = cap
    while tb >= _SUBLANE:
        if rows % tb == 0:
            return tb
        tb -= _SUBLANE
    return rows


def _identity_copy(x: jax.Array) -> jax.Array:
    """Pallas identity copy of `x` (any shape / dtype), lane-dense when possible."""
    orig_shape = x.shape
    total = math.prod(orig_shape) if orig_shape else 1

    if total == 0:
        # Nothing to copy; identity semantics are just "return x".
        return x

    if total % _LANE == 0 and (total // _LANE) % _SUBLANE == 0:
        # Lane-dense path: view as [rows, 128], tile rows, parallel grid.
        rows = total // _LANE
        x2 = x.reshape(rows, _LANE)
        tb = _row_tile(rows, _LANE * x2.dtype.itemsize)
        out = pl.pallas_call(
            _identity_kernel,
            out_shape=jax.ShapeDtypeStruct((rows, _LANE), x2.dtype),
            grid=(rows // tb,),
            in_specs=[pl.BlockSpec((tb, _LANE), lambda i: (i, 0))],
            out_specs=pl.BlockSpec((tb, _LANE), lambda i: (i, 0)),
            input_output_aliases={0: 0},
            compiler_params=pltpu.CompilerParams(
                dimension_semantics=("parallel",)),
        )(x2)
    else:
        # Fallback: single whole-array block (exempt from the (8,128) rule).
        x2 = x.reshape(1, total)
        out = pl.pallas_call(
            _identity_kernel,
            out_shape=jax.ShapeDtypeStruct(x2.shape, x2.dtype),
            in_specs=[pl.BlockSpec(memory_space=pltpu.MemorySpace.VMEM)],
            out_specs=pl.BlockSpec(memory_space=pltpu.MemorySpace.VMEM),
            input_output_aliases={0: 0},
        )(x2)

    return out.reshape(orig_shape)


def ignore_input_preprocess(x, *args, **kwargs):
    """JAX/Pallas analogue of IgnoreInputPreprocessor.forward: returns x."""
    # Extra positional / keyword arguments are ignored, exactly like the
    # PyTorch module's forward.
    del args, kwargs
    return _identity_copy(x)


if __name__ == "__main__":
    import numpy as np

    key = jax.random.PRNGKey(0)
    k1, k2 = jax.random.split(key)

    # Main case: [B, C, H, W] = [2, 4, 16, 16] f32 -> 2048 elems = 16 x 128
    # (lane-dense, gridded, "parallel" path).
    x = jax.random.normal(k1, (2, 4, 16, 16), dtype=jnp.float32)
    x_host = np.asarray(x)  # pull to host before the (aliased) pallas_call
    y = jax.block_until_ready(ignore_input_preprocess(x, 123, extra="ignored"))
    assert y.shape == x.shape and y.dtype == x.dtype
    np.testing.assert_array_equal(np.asarray(y), x_host)

    # Odd-sized case: exercises the whole-array-block fallback path.
    z = jax.random.randint(k2, (2, 3, 7), minval=-5, maxval=5, dtype=jnp.int32)
    z_host = np.asarray(z)
    w = jax.block_until_ready(ignore_input_preprocess(z))
    assert w.shape == z.shape and w.dtype == z.dtype
    np.testing.assert_array_equal(np.asarray(w), z_host)

    print("KERNEL_OK")
</pallas_src>

<mosaic_0001>
module attributes {stable_mosaic.version = 11 : i64} {
  func.func @_identity_kernel(%arg0: i32, %arg1: memref<16x128xf32, #tpu.memory_space<vmem>>, %arg2: memref<16x128xf32, #tpu.memory_space<vmem>>) attributes {dimension_semantics = [#tpu.dimension_semantics<parallel>], iteration_bounds = array<i64: 1>, scalar_prefetch = 0 : i64, scratch_operands = 0 : i64, tpu.core_type = #tpu.core_type<tc>, window_params = [{transform_indices = @transform_0, window_bounds = array<i64: 16, 128>}, {transform_indices = @transform_1, window_bounds = array<i64: 16, 128>}]} {
    %c0 = arith.constant 0 : index
    %c0_0 = arith.constant 0 : index
    %0 = vector.load %arg1[%c0, %c0_0] : memref<16x128xf32, #tpu.memory_space<vmem>>, vector<16x128xf32>
    %c0_1 = arith.constant 0 : index
    %c0_2 = arith.constant 0 : index
    %1 = vector.load %arg2[%c0_1, %c0_2] : memref<16x128xf32, #tpu.memory_space<vmem>>, vector<16x128xf32>
    tpu.vector_store %arg2[%c0_1, %c0_2], %0 {strides = array<i32>} : memref<16x128xf32, #tpu.memory_space<vmem>>, vector<16x128xf32>,
    return
  }
  func.func @transform_0(%arg0: i32) -> (i32, i32) {
    %c0_i32 = arith.constant 0 : i32
    %c0_i32_0 = arith.constant 0 : i32
    return %arg0, %c0_i32 : i32, i32
  }
  func.func @transform_1(%arg0: i32) -> (i32, i32) {
    %c0_i32 = arith.constant 0 : i32
    %c0_i32_0 = arith.constant 0 : i32
    return %arg0, %c0_i32 : i32, i32
  }
}

</mosaic_0001>

<bundles_post_ra>
// kernel: tpu_custom_call.1
= control target key start
LH: loop header
LB: loop body
LE: loop exit
PB: predicated region body
PF: predicated region fallthrough
CT: control target
= control target key end

     0   :  { %6 = vsyncpa [#allocation3], 0  ;;  %s124_s0 = inlined_call_operand.hbm [shape: f32[16,128], index: 0, kind: input, shape index: {}, may-alias: {0,1}]   ;;  %s125_s1 = inlined_call_operand.hbm [shape: f32[16,128], index: 1, kind: output, shape index: {}, may-alias: {0,1}]  }
   0x1   :  { %7 = vsyncpa [#allocation4], 0  ;;  %s12_s8 = sshll.u32 %s124_s0, 4  ;;  %s104_s9 = smov [#allocation2]   ;;  %s13_s8 = int_to_ptr.hbm [resolvable:$true] %s12_s8 }
   0x2   :  { %s14_s10 = sshll.u32 %s104_s9, 4  ;;  %s105_s11 = smov 128   ;;  %s15_s10 = int_to_ptr.vmem [resolvable:$true] %s14_s10 }
   0x3   :  { %s106_s12 = smov 8  }
   0x4   :  { %20 = dma.hbm_to_vmem [thread:$0]  %s13_s8, 256, %s15_s10, [#allocation3], %s105_s11, %s105_s11, %s106_s12  }
   0x5   :  { %100 = dma.done.wait [#allocation3], 256  }
   0x6   :  { %101 = vsyncadd [#allocation3], 4294967040  ;;  %s107_s13 = smov [#allocation5]   ;;  %s35_s17 = sshll.u32 %s125_s1, 4  ;;  %v25_v0 = vld [vmem:[#allocation2] sm:$0xff]  ;;  %v26_v1 = vld [vmem:[#allocation2 + $0x8] sm:$0xff]  ;;  %s36_s17 = int_to_ptr.hbm [resolvable:$true] %s35_s17 }
   0x7   :  { %s33_s14 = sshll.u32 %s107_s13, 4  ;;  %27 = vst [vmem:[#allocation5] sm:$0xff] %v25_v0  ;;  %s34_s14 = int_to_ptr.vmem [resolvable:$true] %s33_s14 }
   0x8   :  { %28 = vst [vmem:[#allocation5 + $0x8] sm:$0xff] %v26_v1 }
   0x9   :  { %41 = dma.vmem_to_hbm [thread:$0]  %s34_s14, 256, %s36_s17, [#allocation4], %s105_s11, %s105_s11, %s106_s12  }
   0xa   :  { %102 = dma.done.wait [#allocation4], 256  }
   0xb   :  { %103 = vsyncadd [#allocation4], 4294967040 }
   0xc   :  { %46 = vsyncpa [#allocation3], 1 }
   0xd   :  { %47 = vsyncpa [#allocation4], 1 }

</bundles_post_ra>
